<compile_context>
chip_gen: v7x
topology: tpu7x:2x2x1
jax: 0.10.0
libtpu: 0.0.40
codegen_flags: <defaults>
</compile_context>

<pallas_src>
import jax
import jax.numpy as jnp
from jax.experimental import pallas as pl
from jax.experimental.pallas import tpu as pltpu


def _make_glu_kernel(k_taps, pad, lane_w, half):
    """Kernel for one lane-dense (C_in, lane_w) block, lane_w = B_blk * L."""

    def kernel(x_ref, w_ref, b_ref, m_ref, o_ref):
        # x_ref : (C_in, lane_w)  f32   batch folded onto the lane axis
        # w_ref : (C_out, K*C_in) bf16  im2col weight, a-half rows then b-half
        # b_ref : (C_out, 1)      f32
        # m_ref : (K, 1, lane_w)  f32   0/1 tap masks (conv zero padding)
        # o_ref : (C_in, lane_w)
        x = x_ref[...]                                    # f32, residual + taps
        c_in = x.shape[0]

        taps = []
        for t in range(k_taps):                           # K is small & static
            d = t - pad                                   # tap offset, [-pad, pad]
            if d == 0:
                taps.append(x)
            elif d > 0:
                sh = jnp.concatenate(
                    [x[:, d:], jnp.zeros((c_in, d), x.dtype)], axis=1)
                taps.append(sh * m_ref[t])                # (1,lane_w) broadcast
            else:
                sh = jnp.concatenate(
                    [jnp.zeros((c_in, -d), x.dtype), x[:, :lane_w + d]], axis=1)
                taps.append(sh * m_ref[t])
        # im2col slab built once per grid step; bf16 MXU operand, f32 accumulate.
        xcol = jnp.concatenate(taps, axis=0).astype(jnp.bfloat16)

        conv = jnp.dot(w_ref[...], xcol,
                       preferred_element_type=jnp.float32) + b_ref[...]
        a = conv[:half, :]               # sublane slice (half is a multiple of 8)
        g = conv[half:, :]
        o_ref[...] = (x + a * jax.nn.sigmoid(g)).astype(o_ref.dtype)

    return kernel


def _vmem_capacity_bytes():
    """Physical VMEM per TensorCore; conservative fallback if unqueryable."""
    cap = 64 * 1024 * 1024                       # v7x-safe default
    try:
        fn = getattr(pltpu, "get_tpu_info", None)
        if fn is not None:
            cap = int(fn().vmem_capacity_bytes)
    except Exception:
        pass
    return cap


def _pick_batch_block(n, c_in, length, k_taps, vmem_budget):
    """Largest batch block whose lane width is a multiple of 128 and whose
    steady-state working set fits the VMEM budget; prefers an even grid so
    both v7x TensorCores get work."""
    # Rough per-unit-of-b_blk bytes: f32 in/out blocks (double-buffered) plus
    # the live im2col slab and f32 conv result inside the kernel body.
    per_b = c_in * length * (32 + 6 * k_taps)
    cap = max(1, vmem_budget // per_b)
    aligned = [d for d in range(1, n + 1)
               if n % d == 0 and (d * length) % 128 == 0]
    if not aligned:
        # No divisor yields a 128-multiple lane width: take the whole batch in
        # one block (lane dim == full array dim is always a legal block).
        # TODO(synk): add an L-axis halo-tiled path for problems where a single
        # (C_in, N*L) slab would exceed the VMEM budget.
        return n
    fit = [d for d in aligned if d <= cap] or [min(aligned)]
    even = [d for d in fit if (n // d) % 2 == 0]
    return max(even) if even else max(fit)


def gated_linear_unit(x, weight, bias, kernel_size):
    """x: (N, C_in, L) f32; weight: (C_out, C_in, K); bias: (C_out,)."""
    n, c_in, length = x.shape
    c_out = weight.shape[0]
    # Even K with padding=K//2 changes the output length, which the residual
    # add in the PyTorch module cannot support either.
    assert kernel_size % 2 == 1, "only odd kernel_size keeps output length == L"
    assert c_out == 2 * c_in, "residual requires output_dim == 2 * input_dim"
    half = c_out // 2
    pad = kernel_size // 2

    # im2col weight: W2[o, t*C_in + c] = W[o, c, t]; bf16 MXU operand.
    w2 = jnp.transpose(weight, (0, 2, 1)).reshape(c_out, kernel_size * c_in)
    w2 = w2.astype(jnp.bfloat16)
    b2 = bias.reshape(c_out, 1).astype(jnp.float32)

    # Lane-dense layout: channels major, batch*length on the lane axis.
    xt = jnp.transpose(x, (1, 0, 2)).reshape(c_in, n * length)

    vmem_cap = _vmem_capacity_bytes()
    b_blk = _pick_batch_block(n, c_in, length, kernel_size,
                              max(8 << 20, vmem_cap // 3))
    lane_w = b_blk * length
    grid = (n // b_blk,)
    vmem_limit = min(96 * 1024 * 1024, (3 * vmem_cap) // 4)

    # 0/1 masks per tap: position l inside its batch segment is valid for tap
    # offset d = t - pad iff 0 <= l + d < L (identical pattern in every block).
    lpos = jnp.arange(lane_w, dtype=jnp.int32) % length                # (lane_w,)
    offs = jnp.arange(kernel_size, dtype=jnp.int32)[:, None] - pad     # (K, 1)
    tapmask = (((lpos[None, :] + offs) >= 0) &
               ((lpos[None, :] + offs) < length)).astype(jnp.float32)
    tapmask = tapmask.reshape(kernel_size, 1, lane_w)

    kernel = _make_glu_kernel(kernel_size, pad, lane_w, half)
    yt = pl.pallas_call(
        kernel,
        out_shape=jax.ShapeDtypeStruct((c_in, n * length), x.dtype),
        grid_spec=pltpu.PrefetchScalarGridSpec(
            num_scalar_prefetch=0,
            grid=grid,
            in_specs=[
                pl.BlockSpec((c_in, lane_w), lambda i: (0, i)),
                pl.BlockSpec((c_out, kernel_size * c_in), lambda i: (0, 0)),
                pl.BlockSpec((c_out, 1), lambda i: (0, 0)),
                pl.BlockSpec((kernel_size, 1, lane_w), lambda i: (0, 0, 0)),
            ],
            out_specs=pl.BlockSpec((c_in, lane_w), lambda i: (0, i)),
        ),
        compiler_params=pltpu.CompilerParams(
            dimension_semantics=("parallel",),
            vmem_limit_bytes=vmem_limit,
        ),
    )(xt, w2, b2, tapmask)

    # Wrapper-side layout plumbing back to the module's (N, C_in, L).
    return yt.reshape(c_in, n, length).transpose(1, 0, 2)


def _reference(x, weight, bias, kernel_size):
    """Pure-JAX reference (lax conv) matching the PyTorch module."""
    pad = kernel_size // 2
    out = jax.lax.conv_general_dilated(
        x, weight,
        window_strides=(1,),
        padding=[(pad, pad)],
        dimension_numbers=("NCH", "OIH", "NCH"),
    ) + bias[None, :, None]
    half = out.shape[1] // 2
    out_a, out_b = out[:, :half, :], out[:, half:, :]
    return x + out_a * jax.nn.sigmoid(out_b)


if __name__ == "__main__":
    # Small shapes consistent with the module: batch=2, input_dim=8,
    # output_dim=16 (= 2*input_dim so the residual is shape-valid), seq=16, k=3.
    batch, input_dim, output_dim, seq_len, kernel_size = 2, 8, 16, 16, 3

    key = jax.random.PRNGKey(0)
    kx, kw, kb = jax.random.split(key, 3)

    x = jax.random.normal(kx, (batch, input_dim, seq_len), dtype=jnp.float32)
    # Deterministic PyTorch-style init: U(-bound, bound), bound = 1/sqrt(C_in*K).
    bound = 1.0 / (input_dim * kernel_size) ** 0.5
    weight = jax.random.uniform(kw, (output_dim, input_dim, kernel_size),
                                minval=-bound, maxval=bound, dtype=jnp.float32)
    bias = jax.random.uniform(kb, (output_dim,),
                              minval=-bound, maxval=bound, dtype=jnp.float32)

    y = gated_linear_unit(x, weight, bias, kernel_size)
    y = jax.block_until_ready(y)

    y_ref = _reference(x, weight, bias, kernel_size)
    assert y.shape == x.shape
    # bf16 MXU operands (f32 accumulation) -> compare against the f32 reference
    # with a correspondingly loosened tolerance.
    assert jnp.allclose(y, y_ref, atol=3e-2, rtol=3e-2), float(
        jnp.max(jnp.abs(y - y_ref)))

    print("KERNEL_OK")
</pallas_src>

<mosaic_0001>
module attributes {stable_mosaic.version = 11 : i64} {
  func.func @kernel(%arg0: i32, %arg1: memref<8x32xf32, #tpu.memory_space<vmem>>, %arg2: memref<16x24xbf16, #tpu.memory_space<vmem>>, %arg3: memref<16x1xf32, #tpu.memory_space<vmem>>, %arg4: memref<3x1x32xf32, #tpu.memory_space<vmem>>, %arg5: memref<8x32xf32, #tpu.memory_space<vmem>>) attributes {dimension_semantics = [#tpu.dimension_semantics<parallel>], iteration_bounds = array<i64: 1>, scalar_prefetch = 0 : i64, scratch_operands = 0 : i64, tpu.core_type = #tpu.core_type<tc>, window_params = [{transform_indices = @transform_0, window_bounds = array<i64: 8, 32>}, {pipeline_mode = #tpu.pipeline_mode<synchronous>, transform_indices = @transform_1, window_bounds = array<i64: 16, 24>}, {pipeline_mode = #tpu.pipeline_mode<synchronous>, transform_indices = @transform_2, window_bounds = array<i64: 16, 1>}, {pipeline_mode = #tpu.pipeline_mode<synchronous>, transform_indices = @transform_3, window_bounds = array<i64: 3, 1, 32>}, {transform_indices = @transform_4, window_bounds = array<i64: 8, 32>}]} {
    %c0 = arith.constant 0 : index
    %c0_0 = arith.constant 0 : index
    %0 = vector.load %arg1[%c0, %c0_0] : memref<8x32xf32, #tpu.memory_space<vmem>>, vector<8x32xf32>
    %cst = arith.constant 0.000000e+00 : f32
    %1 = vector.broadcast %cst : f32 to vector<8x1xf32>
    %2 = vector.extract_strided_slice %0 {offsets = [0, 0], sizes = [8, 31], strides = [1, 1]} : vector<8x32xf32> to vector<8x31xf32>
    %3 = tpu.concatenate %1, %2 in 1 : vector<8x1xf32>, vector<8x31xf32> -> vector<8x32xf32>
    %c0_1 = arith.constant 0 : index
    %c0_2 = arith.constant 0 : index
    %c0_3 = arith.constant 0 : index
    %4 = vector.load %arg4[%c0_1, %c0_2, %c0_3] : memref<3x1x32xf32, #tpu.memory_space<vmem>>, vector<1x1x32xf32>
    %5 = vector.shape_cast %4 : vector<1x1x32xf32> to vector<1x32xf32>
    %6 = vector.broadcast %5 : vector<1x32xf32> to vector<8x32xf32>
    %7 = arith.mulf %3, %6 : vector<8x32xf32>
    %8 = vector.extract_strided_slice %0 {offsets = [0, 1], sizes = [8, 31], strides = [1, 1]} : vector<8x32xf32> to vector<8x31xf32>
    %cst_4 = arith.constant 0.000000e+00 : f32
    %9 = vector.broadcast %cst_4 : f32 to vector<8x1xf32>
    %10 = tpu.concatenate %8, %9 in 1 : vector<8x31xf32>, vector<8x1xf32> -> vector<8x32xf32>
    %c2 = arith.constant 2 : index
    %c0_5 = arith.constant 0 : index
    %c0_6 = arith.constant 0 : index
    %11 = vector.load %arg4[%c2, %c0_5, %c0_6] : memref<3x1x32xf32, #tpu.memory_space<vmem>>, vector<1x1x32xf32>
    %12 = vector.shape_cast %11 : vector<1x1x32xf32> to vector<1x32xf32>
    %13 = vector.broadcast %12 : vector<1x32xf32> to vector<8x32xf32>
    %14 = arith.mulf %10, %13 : vector<8x32xf32>
    %15 = tpu.concatenate %7, %0, %14 in 0 : vector<8x32xf32>, vector<8x32xf32>, vector<8x32xf32> -> vector<24x32xf32>
    %16 = arith.truncf %15 : vector<24x32xf32> to vector<24x32xbf16>
    %c0_7 = arith.constant 0 : index
    %c0_8 = arith.constant 0 : index
    %17 = vector.load %arg2[%c0_7, %c0_8] : memref<16x24xbf16, #tpu.memory_space<vmem>>, vector<16x24xbf16>
    %cst_9 = arith.constant dense<0.000000e+00> : vector<16x32xf32>
    %18 = tpu.matmul %17, %16, %cst_9 {dimension_numbers = #tpu.dot_dimension_numbers<[1], [0], [0], [1], [0, 0, 1, 1], [], []>} : vector<16x24xbf16>, vector<24x32xbf16>, vector<16x32xf32> -> vector<16x32xf32>
    %c0_10 = arith.constant 0 : index
    %c0_11 = arith.constant 0 : index
    %19 = vector.load %arg3[%c0_10, %c0_11] : memref<16x1xf32, #tpu.memory_space<vmem>>, vector<16x1xf32>
    %20 = vector.broadcast %19 : vector<16x1xf32> to vector<16x32xf32>
    %21 = arith.addf %18, %20 : vector<16x32xf32>
    %22 = vector.extract_strided_slice %21 {offsets = [0, 0], sizes = [8, 32], strides = [1, 1]} : vector<16x32xf32> to vector<8x32xf32>
    %23 = vector.extract_strided_slice %21 {offsets = [8, 0], sizes = [8, 32], strides = [1, 1]} : vector<16x32xf32> to vector<8x32xf32>
    %24 = arith.negf %23 : vector<8x32xf32>
    %25 = math.exp %24 : vector<8x32xf32>
    %cst_12 = arith.constant 1.000000e+00 : f32
    %26 = vector.broadcast %cst_12 : f32 to vector<8x32xf32>
    %27 = arith.addf %26, %25 : vector<8x32xf32>
    %28 = arith.divf %26, %27 : vector<8x32xf32>
    %29 = arith.mulf %22, %28 : vector<8x32xf32>
    %30 = arith.addf %0, %29 : vector<8x32xf32>
    %c0_13 = arith.constant 0 : index
    %c0_14 = arith.constant 0 : index
    %31 = vector.load %arg5[%c0_13, %c0_14] : memref<8x32xf32, #tpu.memory_space<vmem>>, vector<8x32xf32>
    tpu.vector_store %arg5[%c0_13, %c0_14], %30 {strides = array<i32>} : memref<8x32xf32, #tpu.memory_space<vmem>>, vector<8x32xf32>,
    return
  }
  func.func @transform_0(%arg0: i32) -> (i32, i32) {
    %c0_i32 = arith.constant 0 : i32
    %c0_i32_0 = arith.constant 0 : i32
    return %c0_i32, %arg0 : i32, i32
  }
  func.func @transform_1(%arg0: i32) -> (i32, i32) {
    %c0_i32 = arith.constant 0 : i32
    %c0_i32_0 = arith.constant 0 : i32
    %c0_i32_1 = arith.constant 0 : i32
    return %c0_i32, %c0_i32_0 : i32, i32
  }
  func.func @transform_2(%arg0: i32) -> (i32, i32) {
    %c0_i32 = arith.constant 0 : i32
    %c0_i32_0 = arith.constant 0 : i32
    %c0_i32_1 = arith.constant 0 : i32
    return %c0_i32, %c0_i32_0 : i32, i32
  }
  func.func @transform_3(%arg0: i32) -> (i32, i32, i32) {
    %c0_i32 = arith.constant 0 : i32
    %c0_i32_0 = arith.constant 0 : i32
    %c0_i32_1 = arith.constant 0 : i32
    %c0_i32_2 = arith.constant 0 : i32
    return %c0_i32, %c0_i32_0, %c0_i32_1 : i32, i32, i32
  }
  func.func @transform_4(%arg0: i32) -> (i32, i32) {
    %c0_i32 = arith.constant 0 : i32
    %c0_i32_0 = arith.constant 0 : i32
    return %c0_i32, %arg0 : i32, i32
  }
}

</mosaic_0001>

<bundles_post_ra>
// kernel: tpu_custom_call.1
= control target key start
LH: loop header
LB: loop body
LE: loop exit
PB: predicated region body
PF: predicated region fallthrough
CT: control target
= control target key end

     0   :  { %s196_s17 = smov 1   ;;  %v197_v1 = vmov 0.0   ;;  %vm198_vm0 = vmmov 0   ;;  %s257_s0 = inlined_call_operand.vmem [shape: f32[8,32], index: 0, kind: input, shape index: {}]   ;;  %s258_s1 = inlined_call_operand.vmem [shape: bf16[16,24], index: 1, kind: input, shape index: {}]   ;;  %s259_s2 = inlined_call_operand.vmem [shape: f32[16,1], index: 2, kind: input, shape index: {}]   ;;  %s260_s3 = inlined_call_operand.vmem [shape: f32[3,1,32], index: 3, kind: input, shape index: {}]   ;;  %s261_s4 = inlined_call_operand.hbm [shape: f32[8,32], index: 4, kind: output, shape index: {}]  }
   0x1   :  { %v19_v0 = vld [vmem:[%s257_s0] sm:$0xff]  ;;  %151 = vmatprep.subr.bf16.mxu0 %v197_v1  ;;  %155 = vmatprep.mubr.msk.bf16.mxu0 %vm198_vm0, %v197_v1  ;;  %v53_v2 = vld [vmem:[%s259_s2 + $0x8] sm:$0xff] }
   0x2   :  { %21 = vrot.lane.b32.xlu0 %v19_v0, %s196_s17 }
   0x3   :  { %9 = vsyncpa [#allocation3], 0  ;;  %v199_v3 = vmov 0   ;;  %s200_s20 = smov 127   ;;  %v52_v4 = vld [vmem:[%s259_s2] sm:$0xff]  ;;  %vm24_vm1 = vcmask 7168  }
   0x4   :  { %165 = vset.pattern.permute.xlu1 %v199_v3  ;;  %166 = vset.pattern.permute.xlu0 %v199_v3  ;;  %v142_v5 = vld [vmem:[%s260_s3] ss:$0 sm:$0xff]  ;;  %vm37_vm2 = vcmask 252928   ;;  %v144_v9 = vld [vmem:[%s260_s3 + $0x2] ss:$0 sm:$0xff]  ;;  %vm73_vm3 = vcmask 1043456  }
   0x5   :  { %61 = vperm.xlu1 %165, %v53_v2   ;;  %v167_v16 = vld [vmem:[%s258_s1] sm:$0xff]   ;;  %vm69_vm4 = vcmask 195584   ;;  %s201_s3 = smov [#allocation2]   ;;  %vm126_vm5 = vcmask 261120  }
   0x6   :  { %34 = vrot.lane.b32.xlu0 %v19_v0, %s200_s20  ;;  %s134_s27 = sshll.u32 %s201_s3, 4  ;;  %s135_s27 = int_to_ptr.vmem [resolvable:$true] %s134_s27 }
   0x7   :  { %s172_s1 = scalar_lea.vmem %s135_s27, 128  ;;  %p177_p1 = scmp.lt.s32.totalorder %s135_s27, %s135_s27 }
   0x8   :  { %p173_p0 = scmp.ne.s32.totalorder %s135_s27, %s172_s1  ;;  %p178_p2 = scmp.lt.s32.totalorder %s172_s1, %s172_s1 }
   0x9   :  { %56 = vperm.xlu1 %165, %v52_v4  }
   0xa   :  { %p179_p3 = por %p178_p2, %p177_p1 }
   0xc   :  { %p180_p4 = pnand %p179_p3, %p173_p0 }
  0x74   :  { %v22_v6 = vpop.permute.xlu0 %21 }
  0x75   :  { %v25_v7 = vsel %vm24_vm1, 0.0, %v22_v6 }
  0x76   :  { %v33_v8 = vmul.f32 %v142_v5, %v25_v7 }
  0x78   :  { %v35_v10 = vpop.permute.xlu0 %34  ;;  %v48_v11 = vpack.c.bf16 %v19_v0, %v33_v8 }
  0x79   :  { %v38_v12 = vsel %vm37_vm2, %v35_v10, 0.0 }
  0x7a   :  { %v47_v13 = vmul.f32 %v144_v9, %v38_v12  ;;  %152 = vmatpush3.bf16.msra.mxu0 %v48_v11 }
  0x7b   :  { %153 = vmatprep.subr.bf16.mxu0 %v197_v1 }
  0x7c   :  { %v49_v14 = vpack.c.bf16 %v47_v13, %v47_v13 }
  0x7e   :  { %v75_v15 = vsel %vm73_vm3, %v49_v14, 0 }
  0x7f   :  { %154 = vmatpush3.bf16.msra.mxu0 %v75_v15 }
  0x82   :  { %156 = vmatmul.mubr.msk.bf16.vlgmr.msra.gmra.mrb[0].mxu0 %vm69_vm4, %v167_v16 }
  0x84   :  { %v62_v19 = vpop.permute.xlu1 %61 }
  0x88   :  { %v57_v26 = vpop.permute.xlu1 %56 }
 0x155   :  { %v111_v17 = vpop.f32.mrb[0].mxu0 }
 0x156   :  { %v157_v18 = vpop.f32.mrb[1].mxu0  ;;  %v112_v27 = vadd.f32 %v111_v17, %v57_v26 }
 0x157   :  { %v114_v20 = vpop.f32.mrb[2].mxu0 }
 0x158   :  { %v115_v21 = vadd.f32 %v114_v20, %v62_v19  ;;  %v158_v22 = vpop.f32.mrb[3].mxu0 }
 0x15a   :  { %v147_v23 = vmul.f32 -1.442695, %v115_v21 }
 0x15c   :  { %168 = vpow2.f32 %v147_v23 }
 0x166   :  { %v169_v24 = vpop.eup %168 }
 0x167   :  { %v121_v25 = vadd.f32 1.0, %v169_v24 }
 0x169   :  { %170 = vrcp.f32 %v121_v25 }
 0x173   :  { %v171_v28 = vpop.eup %170 }
 0x174   :  { %v124_v29 = vmul.f32 %v171_v28, %v112_v27 }
 0x176   :  { %v125_v30 = vadd.f32 %v124_v29, %v19_v0 }
 0x178   :  { %127 = vst.msk [vmem:[#allocation2] sm:$0xff] %vm126_vm5, %v125_v30 }
 0x179   :  { %183 = shalt.err (!%p180_p4)
}
 0x17a   :  { %s184_s30 = scalar_lea.hbm %s261_s4, 128 }
 0x17b   :  { %p185_p5 = scmp.ne.s32.totalorder %s261_s4, %s184_s30  ;;  %p188_p6 = scmp.lt.u32.totalorder %s184_s30, %s261_s4 }
 0x17d   :  { %p190_p7 = pnand %p188_p6, %p185_p5 }
 0x17f   :  { %193 = shalt.err (!%p190_p7)
}
 0x180   :  { %137 = dma.vmem_to_hbm [thread:$0]  %s135_s27, 128, %s261_s4, [#allocation3]  }
 0x181   :  { %194 = dma.done.wait [#allocation3], 128  }
 0x182   :  { %195 = vsyncadd [#allocation3], 4294967168 }
 0x183   :  { %141 = vsyncpa [#allocation3], 1 }

</bundles_post_ra>
